<compile_context>
chip_gen: v6e
topology: v6e:2x2x1
jax: 0.10.0
libtpu: 0.0.40
codegen_flags: <defaults>
</compile_context>

<pallas_src>
import functools

import jax
import jax.numpy as jnp
from jax.experimental import pallas as pl
from jax.experimental.pallas import tpu as pltpu

input_size = 10
hidden_size = 20
output_size = 5

LANE = 128      # vreg lane width
SUBLANE = 8     # f32 sublane width


def mlp_kernel(x_ref, w1_ref, b1_ref, w2_ref, b2_ref, o_ref):
    # fc1 + ReLU: MXU matmul with f32 accumulation, bias-add + max on the VPU.
    h = jnp.dot(x_ref[...], w1_ref[...], preferred_element_type=jnp.float32)
    h = jnp.maximum(h + b1_ref[...], 0.0)     # b1 is (1, Hp) -> broadcasts over batch
    # fc2 (single cast before the second MXU pass; no-op for f32 weights).
    o = jnp.dot(h.astype(w2_ref.dtype), w2_ref[...],
                preferred_element_type=jnp.float32)
    o_ref[...] = (o + b2_ref[...]).astype(o_ref.dtype)


def _round_up(n, m):
    return ((n + m - 1) // m) * m


def pad_params(w1, b1, w2, b2):
    """Pad ONLY the hidden axis to a lane multiple. Call once at init and cache.

    Padded hidden lanes have zero weight and zero bias, so they stay 0 after
    ReLU and contribute nothing through the second matmul (no leakage).
    """
    H = w1.shape[1]
    Hp = _round_up(H, LANE)
    w1_p = jnp.pad(w1, ((0, 0), (0, Hp - H)))
    b1_p = jnp.pad(b1, ((0, 0), (0, Hp - H)))
    w2_p = jnp.pad(w2, ((0, Hp - H), (0, 0)))
    return w1_p, b1_p, w2_p, b2


def _pick_tb(B, cap):
    """Batch tile: multiple of 8 sublanes, capped; >=2 grid steps for B > 64
    so the "parallel" batch axis shards across both v7x TensorCores."""
    tb = min(cap, _round_up(B, SUBLANE))
    if B > 64:
        half = _round_up(pl.cdiv(_round_up(B, SUBLANE), 2), SUBLANE)
        tb = min(tb, half)
    return max(tb, SUBLANE)


@functools.partial(jax.jit, static_argnames=("tb",))
def simple_nn_forward(x, w1_p, b1_p, w2_p, b2_p, *, tb=4096):
    """x: (B, input_size) f32; padded params from pad_params().
    Returns (B, output_size) f32."""
    B, K = x.shape
    Hp = w1_p.shape[1]
    N = w2_p.shape[1]

    TB = _pick_tb(B, tb)
    Bp = _round_up(B, TB)
    # Only the batch axis is ever padded (cheap: x is K=10 lanes wide); the
    # feature axes of x/out stream unpadded (full-dim last axes are exempt
    # from the 128-lane rule, masked vst on the 5-wide output is a bounded cost).
    x_p = x if Bp == B else jnp.pad(x, ((0, Bp - B), (0, 0)))

    grid = (Bp // TB,)

    cost = pl.CostEstimate(
        flops=2 * Bp * (K * Hp + Hp * N),
        transcendentals=0,
        bytes_accessed=4 * (Bp * K + K * Hp + Hp + Hp * N + N + Bp * N),
    )

    out_p = pl.pallas_call(
        mlp_kernel,
        out_shape=jax.ShapeDtypeStruct((Bp, N), jnp.float32),
        grid=grid,
        in_specs=[
            pl.BlockSpec((TB, K), lambda i: (i, 0)),    # x: batch-tiled, unpadded lanes
            pl.BlockSpec((K, Hp), lambda i: (0, 0)),    # W1: resident
            pl.BlockSpec((1, Hp), lambda i: (0, 0)),    # b1: resident
            pl.BlockSpec((Hp, N), lambda i: (0, 0)),    # W2: resident
            pl.BlockSpec((1, N), lambda i: (0, 0)),     # b2: resident
        ],
        out_specs=pl.BlockSpec((TB, N), lambda i: (i, 0)),
        compiler_params=pltpu.CompilerParams(
            dimension_semantics=("parallel",),          # megacore on v7x
        ),
        cost_estimate=cost,
    )(x_p, w1_p, b1_p, w2_p, b2_p)

    # Padded batch rows contain bias-derived garbage -> always strip them.
    return out_p if Bp == B else out_p[:B]


def init_params(key):
    """Deterministic parameter init matching nn.Linear shapes (stored transposed)."""
    k1, k2, k3, k4 = jax.random.split(key, 4)
    # PyTorch nn.Linear default init: U(-1/sqrt(fan_in), 1/sqrt(fan_in))
    lim1 = 1.0 / jnp.sqrt(jnp.float32(input_size))
    lim2 = 1.0 / jnp.sqrt(jnp.float32(hidden_size))
    w1 = jax.random.uniform(k1, (input_size, hidden_size), jnp.float32, -lim1, lim1)
    b1 = jax.random.uniform(k2, (1, hidden_size), jnp.float32, -lim1, lim1)
    w2 = jax.random.uniform(k3, (hidden_size, output_size), jnp.float32, -lim2, lim2)
    b2 = jax.random.uniform(k4, (1, output_size), jnp.float32, -lim2, lim2)
    return w1, b1, w2, b2


if __name__ == "__main__":
    key = jax.random.PRNGKey(0)
    kx, kp = jax.random.split(key)
    batch = 8
    x = jax.random.normal(kx, (batch, input_size), jnp.float32)
    w1, b1, w2, b2 = init_params(kp)

    # Pad weights once at init (hoisted out of the per-call path).
    w1_p, b1_p, w2_p, b2_p = pad_params(w1, b1, w2, b2)

    out = simple_nn_forward(x, w1_p, b1_p, w2_p, b2_p)
    out = jax.block_until_ready(out)

    # Correctness check against a pure-JAX reference of the same forward pass.
    ref = jnp.maximum(x @ w1 + b1, 0.0) @ w2 + b2
    assert out.shape == (batch, output_size)
    assert jnp.allclose(out, ref, atol=1e-5, rtol=1e-5)

    # Larger, non-multiple batch: exercises the >=2-step grid + batch-pad path.
    xb = jax.random.normal(kx, (1000, input_size), jnp.float32)
    outb = jax.block_until_ready(simple_nn_forward(xb, w1_p, b1_p, w2_p, b2_p))
    refb = jnp.maximum(xb @ w1 + b1, 0.0) @ w2 + b2
    assert outb.shape == (1000, output_size)
    assert jnp.allclose(outb, refb, atol=1e-5, rtol=1e-5)

    print("KERNEL_OK")
</pallas_src>

<mosaic_0001>
module attributes {stable_mosaic.version = 11 : i64} {
  func.func @mlp_kernel(%arg0: i32, %arg1: memref<8x10xf32, #tpu.memory_space<vmem>>, %arg2: memref<10x128xf32, #tpu.memory_space<vmem>>, %arg3: memref<1x128xf32, #tpu.memory_space<vmem>>, %arg4: memref<128x5xf32, #tpu.memory_space<vmem>>, %arg5: memref<1x5xf32, #tpu.memory_space<vmem>>, %arg6: memref<8x5xf32, #tpu.memory_space<vmem>>) attributes {dimension_semantics = [#tpu.dimension_semantics<parallel>], iteration_bounds = array<i64: 1>, scalar_prefetch = 0 : i64, scratch_operands = 0 : i64, tpu.core_type = #tpu.core_type<tc>, window_params = [{transform_indices = @transform_0, window_bounds = array<i64: 8, 10>}, {pipeline_mode = #tpu.pipeline_mode<synchronous>, transform_indices = @transform_1, window_bounds = array<i64: 10, 128>}, {pipeline_mode = #tpu.pipeline_mode<synchronous>, transform_indices = @transform_2, window_bounds = array<i64: 1, 128>}, {pipeline_mode = #tpu.pipeline_mode<synchronous>, transform_indices = @transform_3, window_bounds = array<i64: 128, 5>}, {pipeline_mode = #tpu.pipeline_mode<synchronous>, transform_indices = @transform_4, window_bounds = array<i64: 1, 5>}, {transform_indices = @transform_5, window_bounds = array<i64: 8, 5>}]} {
    %c0 = arith.constant 0 : index
    %c0_0 = arith.constant 0 : index
    %0 = vector.load %arg1[%c0, %c0_0] : memref<8x10xf32, #tpu.memory_space<vmem>>, vector<8x10xf32>
    %c0_1 = arith.constant 0 : index
    %c0_2 = arith.constant 0 : index
    %1 = vector.load %arg2[%c0_1, %c0_2] : memref<10x128xf32, #tpu.memory_space<vmem>>, vector<10x128xf32>
    %cst = arith.constant dense<0.000000e+00> : vector<8x128xf32>
    %2 = tpu.matmul %0, %1, %cst {dimension_numbers = #tpu.dot_dimension_numbers<[1], [0], [0], [1], [0, 0, 1, 1], [], []>} : vector<8x10xf32>, vector<10x128xf32>, vector<8x128xf32> -> vector<8x128xf32>
    %c0_3 = arith.constant 0 : index
    %c0_4 = arith.constant 0 : index
    %3 = vector.load %arg3[%c0_3, %c0_4] : memref<1x128xf32, #tpu.memory_space<vmem>>, vector<1x128xf32>
    %4 = vector.broadcast %3 : vector<1x128xf32> to vector<8x128xf32>
    %5 = arith.addf %2, %4 : vector<8x128xf32>
    %cst_5 = arith.constant 0.000000e+00 : f32
    %6 = vector.broadcast %cst_5 : f32 to vector<8x128xf32>
    %7 = arith.maximumf %5, %6 : vector<8x128xf32>
    %c0_6 = arith.constant 0 : index
    %c0_7 = arith.constant 0 : index
    %8 = vector.load %arg4[%c0_6, %c0_7] : memref<128x5xf32, #tpu.memory_space<vmem>>, vector<128x5xf32>
    %cst_8 = arith.constant dense<0.000000e+00> : vector<8x5xf32>
    %9 = tpu.matmul %7, %8, %cst_8 {dimension_numbers = #tpu.dot_dimension_numbers<[1], [0], [0], [1], [0, 0, 1, 1], [], []>} : vector<8x128xf32>, vector<128x5xf32>, vector<8x5xf32> -> vector<8x5xf32>
    %c0_9 = arith.constant 0 : index
    %c0_10 = arith.constant 0 : index
    %10 = vector.load %arg5[%c0_9, %c0_10] : memref<1x5xf32, #tpu.memory_space<vmem>>, vector<1x5xf32>
    %11 = vector.broadcast %10 : vector<1x5xf32> to vector<8x5xf32>
    %12 = arith.addf %9, %11 : vector<8x5xf32>
    %c0_11 = arith.constant 0 : index
    %c0_12 = arith.constant 0 : index
    %13 = vector.load %arg6[%c0_11, %c0_12] : memref<8x5xf32, #tpu.memory_space<vmem>>, vector<8x5xf32>
    tpu.vector_store %arg6[%c0_11, %c0_12], %12 {strides = array<i32>} : memref<8x5xf32, #tpu.memory_space<vmem>>, vector<8x5xf32>,
    return
  }
  func.func @transform_0(%arg0: i32) -> (i32, i32) {
    %c0_i32 = arith.constant 0 : i32
    %c0_i32_0 = arith.constant 0 : i32
    return %arg0, %c0_i32 : i32, i32
  }
  func.func @transform_1(%arg0: i32) -> (i32, i32) {
    %c0_i32 = arith.constant 0 : i32
    %c0_i32_0 = arith.constant 0 : i32
    %c0_i32_1 = arith.constant 0 : i32
    return %c0_i32, %c0_i32_0 : i32, i32
  }
  func.func @transform_2(%arg0: i32) -> (i32, i32) {
    %c0_i32 = arith.constant 0 : i32
    %c0_i32_0 = arith.constant 0 : i32
    %c0_i32_1 = arith.constant 0 : i32
    return %c0_i32, %c0_i32_0 : i32, i32
  }
  func.func @transform_3(%arg0: i32) -> (i32, i32) {
    %c0_i32 = arith.constant 0 : i32
    %c0_i32_0 = arith.constant 0 : i32
    %c0_i32_1 = arith.constant 0 : i32
    return %c0_i32, %c0_i32_0 : i32, i32
  }
  func.func @transform_4(%arg0: i32) -> (i32, i32) {
    %c0_i32 = arith.constant 0 : i32
    %c0_i32_0 = arith.constant 0 : i32
    %c0_i32_1 = arith.constant 0 : i32
    return %c0_i32, %c0_i32_0 : i32, i32
  }
  func.func @transform_5(%arg0: i32) -> (i32, i32) {
    %c0_i32 = arith.constant 0 : i32
    %c0_i32_0 = arith.constant 0 : i32
    return %arg0, %c0_i32 : i32, i32
  }
}

</mosaic_0001>

<bundles_post_ra>
// kernel: simple_nn_forward.1
= control target key start
LH: loop header
LB: loop body
LE: loop exit
PB: predicated region body
PF: predicated region fallthrough
CT: control target
= control target key end

     0   :  { %vm35_vm0 = vcmask 1041408   ;;  %v310_v1 = vmov 0.0   ;;  %vm311_vm1 = vmmov 0   ;;  %vm31_vm2 = vcmask 80896   ;;  %s411_s0 = inlined_call_operand.vmem [shape: f32[8,10], index: 0, kind: input, shape index: {}]   ;;  %s412_s1 = inlined_call_operand.vmem [shape: f32[10,128], index: 1, kind: input, shape index: {}]   ;;  %s413_s2 = inlined_call_operand.vmem [shape: f32[1,128], index: 2, kind: input, shape index: {}]   ;;  %s414_s3 = inlined_call_operand.vmem [shape: f32[128,5], index: 3, kind: input, shape index: {}]   ;;  %s415_s4 = inlined_call_operand.vmem [shape: f32[1,5], index: 4, kind: input, shape index: {}]   ;;  %s416_s5 = inlined_call_operand.hbm [shape: f32[8,5], index: 5, kind: output, shape index: {}]  }
   0x1   :  { %v23_v0 = vld [vmem:[%s412_s1 + $0x8] sm:$0x3]  ;;  %243 = vmatprep.subr.mxu0 %v310_v1  ;;  %v22_v2 = vld [vmem:[%s412_s1] sm:$0xff]  ;;  %247 = vmatprep.mubr.msk.f32.mxu0 %vm311_vm1, %v310_v1  ;;  %v125_v3 = vld [vmem:[%s414_s3 + $0x78] sm:$0xff] }
   0x2   :  { %244 = vmatpush3.msk.msra.mxu0 %vm35_vm0, %v23_v0  ;;  %v21_v4 = vld [vmem:[%s411_s0] sm:$0xff]  ;;  %250 = vmatprep.subr.mxu1 %v310_v1  ;;  %v124_v5 = vld [vmem:[%s414_s3 + $0x70] sm:$0xff]  ;;  %v123_v6 = vld [vmem:[%s414_s3 + $0x68] sm:$0xff] }
   0x3   :  { %245 = vmatprep.subr.mxu0 %v310_v1  ;;  %251 = vmatpush3.msra.mxu1 %v125_v3  ;;  %v122_v7 = vld [vmem:[%s414_s3 + $0x60] sm:$0xff] }
   0x4   :  { %246 = vmatpush3.msra.mxu0 %v22_v2  ;;  %252 = vmatprep.subr.mxu1 %v310_v1 }
   0x5   :  { %248 = vmatmul.mubr.msk.f32.vlgmr.msra.gmra.mxu0 %vm31_vm2, %v21_v4  ;;  %253 = vmatpush3.msra.mxu1 %v124_v5 }
   0x6   :  { %254 = vmatprep.subr.mxu1 %v310_v1  ;;  %282 = vmatprep.mubr.msk.f32.mxu1 %vm311_vm1, %v310_v1 }
   0x7   :  { %10 = vsyncpa [#allocation3], 0  ;;  %255 = vmatpush3.msra.mxu1 %v123_v6  ;;  %v121_v8 = vld [vmem:[%s414_s3 + $0x58] sm:$0xff]  ;;  %v120_v9 = vld [vmem:[%s414_s3 + $0x50] sm:$0xff]  ;;  %s312_s6 = smov [#allocation2]   ;;  %vm203_vm3 = vcmask 39936  }
   0x8   :  { %256 = vmatprep.subr.mxu1 %v310_v1  ;;  %v119_v10 = vld [vmem:[%s414_s3 + $0x48] sm:$0xff]  ;;  %v118_v11 = vld [vmem:[%s414_s3 + $0x40] sm:$0xff]  ;;  %v117_v12 = vld [vmem:[%s414_s3 + $0x38] sm:$0xff]  ;;  %s211_s7 = sshll.u32 %s312_s6, 4  ;;  %s212_s7 = int_to_ptr.vmem [resolvable:$true] %s211_s7 }
   0x9   :  { %257 = vmatpush3.msra.mxu1 %v122_v7  ;;  %v116_v13 = vld [vmem:[%s414_s3 + $0x30] sm:$0xff]  ;;  %v115_v14 = vld [vmem:[%s414_s3 + $0x28] sm:$0xff]  ;;  %v114_v15 = vld [vmem:[%s414_s3 + $0x20] sm:$0xff]  ;;  %p293_p1 = scmp.lt.s32.totalorder %s212_s7, %s212_s7 }
   0xa   :  { %258 = vmatprep.subr.mxu1 %v310_v1  ;;  %v113_v16 = vld [vmem:[%s414_s3 + $0x18] sm:$0xff]  ;;  %v112_v17 = vld [vmem:[%s414_s3 + $0x10] sm:$0xff]  ;;  %v111_v18 = vld [vmem:[%s414_s3 + $0x8] sm:$0xff] }
   0xb   :  { %259 = vmatpush3.msra.mxu1 %v121_v8  ;;  %v110_v19 = vld [vmem:[%s414_s3] sm:$0xff]  ;;  %s288_s3 = scalar_lea.vmem %s212_s7, 128 }
   0xc   :  { %260 = vmatprep.subr.mxu1 %v310_v1  ;;  %v219_v20 = vld [vmem:[%s413_s2] ss:$0 sm:$0xff]  ;;  %p289_p0 = scmp.ne.s32.totalorder %s212_s7, %s288_s3  ;;  %p294_p2 = scmp.lt.s32.totalorder %s288_s3, %s288_s3 }
   0xd   :  { %261 = vmatpush3.msra.mxu1 %v120_v9  ;;  %v222_v25 = vld [vmem:[%s415_s4] ss:$0 sm:$0xff] }
   0xe   :  { %262 = vmatprep.subr.mxu1 %v310_v1  ;;  %p295_p3 = por %p294_p2, %p293_p1 }
   0xf   :  { %263 = vmatpush3.msra.mxu1 %v119_v10 }
  0x10   :  { %264 = vmatprep.subr.mxu1 %v310_v1  ;;  %p296_p4 = pnand %p295_p3, %p289_p0 }
  0x11   :  { %265 = vmatpush3.msra.mxu1 %v118_v11 }
  0x12   :  { %266 = vmatprep.subr.mxu1 %v310_v1 }
  0x13   :  { %267 = vmatpush3.msra.mxu1 %v117_v12 }
  0x14   :  { %268 = vmatprep.subr.mxu1 %v310_v1 }
  0x15   :  { %269 = vmatpush3.msra.mxu1 %v116_v13 }
  0x16   :  { %270 = vmatprep.subr.mxu1 %v310_v1 }
  0x17   :  { %271 = vmatpush3.msra.mxu1 %v115_v14 }
  0x18   :  { %272 = vmatprep.subr.mxu1 %v310_v1 }
  0x19   :  { %273 = vmatpush3.msra.mxu1 %v114_v15 }
  0x1a   :  { %274 = vmatprep.subr.mxu1 %v310_v1 }
  0x1b   :  { %275 = vmatpush3.msra.mxu1 %v113_v16 }
  0x1c   :  { %276 = vmatprep.subr.mxu1 %v310_v1 }
  0x1d   :  { %277 = vmatpush3.msra.mxu1 %v112_v17 }
  0x1e   :  { %278 = vmatprep.subr.mxu1 %v310_v1 }
  0x1f   :  { %279 = vmatpush3.msra.mxu1 %v111_v18 }
  0x20   :  { %280 = vmatprep.subr.mxu1 %v310_v1 }
  0x21   :  { %281 = vmatpush3.msra.mxu1 %v110_v19 }
  0xc5   :  { %v105_v21 = vpop.f32.mrf.mxu0 }
  0xc6   :  { %v106_v22 = vadd.f32 %v219_v20, %v105_v21 }
  0xc7   :  { %v249_v23 = vpop.f32.mrf.mxu0 }
  0xc8   :  { %v109_v24 = vmax.f32 %v106_v22, 0.0 }
  0xca   :  { %283 = vmatmul.mubr.f32.vlgmr.msra.gmra.mxu1 %v109_v24 }
 0x18a   :  { %v199_v26 = vpop.f32.mrf.mxu1 }
 0x18b   :  { %v200_v27 = vadd.f32 %v222_v25, %v199_v26 }
 0x18c   :  { %v284_v28 = vpop.f32.mrf.mxu1 }
 0x18d   :  { %204 = vst.msk [vmem:[#allocation2] sm:$0xff] %vm203_vm3, %v200_v27 }
 0x18e   :  { %299 = shalt.err (!%p296_p4)
}
 0x18f   :  { %214 = dma.vmem_to_hbm [thread:$0]  %s212_s7, 128, %s416_s5, [#allocation3]  }
 0x190   :  { %308 = dma.done.wait [#allocation3], 128  }
 0x191   :  { %309 = vsyncadd [#allocation3], 4294967168 }
 0x192   :  { %218 = vsyncpa [#allocation3], 1 }

</bundles_post_ra>
